<compile_context>
chip_gen: v7x
topology: tpu7x:2x2x1
jax: 0.10.0
libtpu: 0.0.40
codegen_flags: <defaults>
</compile_context>

<pallas_src>
import functools

import jax
import jax.numpy as jnp
from jax import lax
from jax.experimental import pallas as pl
from jax.experimental.pallas import tpu as pltpu


def _round_up(v, m):
    return ((v + m - 1) // m) * m


def _round_down(v, m):
    return (v // m) * m


def _vmem_physical_bytes():
    """Physical per-core VMEM (128 MiB v5e/v6e, 64 MiB v7x); safe fallback."""
    try:
        info = pltpu.get_tpu_info()
        cap = getattr(info, "vmem_capacity_bytes", None)
        if cap:
            return int(cap)
    except Exception:
        pass
    return 64 * 1024 * 1024  # conservative: v7x per-TensorCore VMEM


# ---------------------------------------------------------------------------
# Kernels
# ---------------------------------------------------------------------------
def _norm_rows_kernel(x_ref, o_ref, *, epsilon):
    """(row_tile, hw) block; each row is one (batch, channel) instance."""
    x = x_ref[...].astype(jnp.float32)
    mean = jnp.mean(x, axis=-1, keepdims=True)
    xc = x - mean
    # Two-pass centered variance (matches PyTorch reference numerics).
    var = jnp.mean(xc * xc, axis=-1, keepdims=True)
    o_ref[...] = (xc * lax.rsqrt(var + epsilon)).astype(o_ref.dtype)


def _norm_cols_kernel(x_ref, o_ref, *, epsilon):
    """(hw, col_tile) block; instances live on the lane (last) axis.

    Used when H*W < 128 so every vector store stays lane-dense."""
    x = x_ref[...].astype(jnp.float32)
    mean = jnp.mean(x, axis=0, keepdims=True)
    xc = x - mean
    var = jnp.mean(xc * xc, axis=0, keepdims=True)
    o_ref[...] = (xc * lax.rsqrt(var + epsilon)).astype(o_ref.dtype)


def _stats_kernel(x_ref, mean_ref, inv_ref, sum_ref, ssq_ref,
                  *, epsilon, hw, hw_block):
    """Accumulate per-row sum / sum-of-squares over hw blocks; finalize last."""
    k = pl.program_id(1)

    @pl.when(k == 0)
    def _():
        sum_ref[...] = jnp.zeros_like(sum_ref)
        ssq_ref[...] = jnp.zeros_like(ssq_ref)

    x = x_ref[...].astype(jnp.float32)
    # Mask out-of-range columns of the (possibly partial) last hw block so
    # padded garbage never pollutes the reductions.
    col = lax.broadcasted_iota(jnp.int32, x.shape, 1) + k * hw_block
    x = jnp.where(col < hw, x, 0.0)
    sum_ref[...] += jnp.sum(x, axis=-1, keepdims=True)
    ssq_ref[...] += jnp.sum(x * x, axis=-1, keepdims=True)

    @pl.when(k == pl.num_programs(1) - 1)
    def _():
        inv_n = jnp.float32(1.0 / hw)
        mean = sum_ref[...] * inv_n
        # One-pass variance (E[x^2] - mean^2) with f32 accumulation; clamped
        # at 0 for safety.  (Slightly less stable than the centered two-pass
        # form, acceptable at the f32 tolerances used here.)
        var = jnp.maximum(ssq_ref[...] * inv_n - mean * mean, 0.0)
        mean_ref[...] = mean
        inv_ref[...] = lax.rsqrt(var + epsilon)


def _apply_kernel(x_ref, mean_ref, inv_ref, o_ref):
    x = x_ref[...].astype(jnp.float32)
    o_ref[...] = ((x - mean_ref[...]) * inv_ref[...]).astype(o_ref.dtype)


# ---------------------------------------------------------------------------
# Wrapper
# ---------------------------------------------------------------------------
def instance_norm(x, epsilon=1e-8, *, hw_block=None):
    """Pallas InstanceNorm matching the PyTorch reference forward().

    x: (B, C, H, W) array (NCHW).  Returns array of same shape/dtype.
    hw_block: optional override forcing the split-reduction path (testing).
    """
    B, C, H, W = x.shape
    rows = B * C
    hw = H * W
    itemsize = jnp.dtype(x.dtype).itemsize
    # Sublane packing: 8 rows/vreg-group for f32, 16 for bf16, 32 for int8/fp8.
    pack = max(8, 32 // itemsize)

    physical = _vmem_physical_bytes()
    vmem_limit = int(physical * 0.75)      # explicitly raised scoped VMEM limit
    block_budget = int(physical * 0.45)    # per-step pipelined buffers + temps

    x2d = x.reshape(rows, hw)

    # Bytes per instance-row per grid step: double-buffered in + out blocks,
    # plus ~2 f32 temporaries from the in-kernel float32 promotion.
    bytes_per_row_full_hw = hw * (4 * itemsize + 2 * 4)
    fits_full_hw = bytes_per_row_full_hw * pack <= block_budget

    params_1d = pltpu.CompilerParams(
        dimension_semantics=("parallel",), vmem_limit_bytes=vmem_limit)

    if hw_block is None and fits_full_hw and not (hw < 128 and rows >= 128):
        # --- Path A: full H*W per block, tile over instance rows. ----------
        # NOTE: if hw is not a multiple of 128 (e.g. 14x14=196) the lane dim is
        # partially masked; padding hw is a possible further optimization.
        max_rows_budget = block_budget // bytes_per_row_full_hw
        row_tile = min(max_rows_budget, 2048, _round_up(rows, pack))
        # Keep >= 2 grid steps when there is enough work (v7x 2-TC megacore
        # sharding + pipelining); a single giant block serializes on one TC.
        if rows >= 2 * pack and row_tile * 2 > rows:
            row_tile = min(row_tile, _round_up(pl.cdiv(rows, 2), pack))
        row_tile = max(pack, _round_down(row_tile, pack))
        grid = (pl.cdiv(rows, row_tile),)

        out2d = pl.pallas_call(
            functools.partial(_norm_rows_kernel, epsilon=epsilon),
            out_shape=jax.ShapeDtypeStruct((rows, hw), x.dtype),
            grid_spec=pltpu.PrefetchScalarGridSpec(
                num_scalar_prefetch=0,
                grid=grid,
                in_specs=[pl.BlockSpec((row_tile, hw), lambda i: (i, 0))],
                out_specs=pl.BlockSpec((row_tile, hw), lambda i: (i, 0)),
            ),
            compiler_params=params_1d,
        )(x2d)
        return out2d.reshape(B, C, H, W)

    if hw_block is None and fits_full_hw:
        # --- Path C: H*W < 128 -> lane-dense transposed layout. ------------
        # Instances on the lane (last) axis, spatial on sublanes.
        xT = x2d.T                                            # (hw, rows)
        max_cols_budget = block_budget // bytes_per_row_full_hw
        col_tile = min(max_cols_budget, 2048, _round_up(rows, 128))
        if rows >= 256 and col_tile * 2 > rows:
            col_tile = min(col_tile, _round_up(pl.cdiv(rows, 2), 128))
        col_tile = max(128, _round_down(col_tile, 128))
        grid = (pl.cdiv(rows, col_tile),)

        outT = pl.pallas_call(
            functools.partial(_norm_cols_kernel, epsilon=epsilon),
            out_shape=jax.ShapeDtypeStruct((hw, rows), x.dtype),
            grid_spec=pltpu.PrefetchScalarGridSpec(
                num_scalar_prefetch=0,
                grid=grid,
                in_specs=[pl.BlockSpec((hw, col_tile), lambda i: (0, i))],
                out_specs=pl.BlockSpec((hw, col_tile), lambda i: (0, i)),
            ),
            compiler_params=params_1d,
        )(xT)
        return outT.T.reshape(B, C, H, W)

    # --- Path B: H*W too large for one block -> split the reduction axis. --
    row_tile = pack
    per_elem = 4 * itemsize + 2 * 4
    if hw_block is None:
        hw_block = block_budget // (row_tile * per_elem)
    hw_block = min(hw_block, _round_up(hw, 128))
    hw_block = max(128, _round_down(hw_block, 128))
    n_row_blocks = pl.cdiv(rows, row_tile)
    n_hw_blocks = pl.cdiv(hw, hw_block)

    stats_kernel = functools.partial(
        _stats_kernel, epsilon=epsilon, hw=hw, hw_block=hw_block)

    mean, inv = pl.pallas_call(
        stats_kernel,
        out_shape=(jax.ShapeDtypeStruct((rows, 1), jnp.float32),
                   jax.ShapeDtypeStruct((rows, 1), jnp.float32)),
        grid_spec=pltpu.PrefetchScalarGridSpec(
            num_scalar_prefetch=0,
            grid=(n_row_blocks, n_hw_blocks),
            in_specs=[pl.BlockSpec((row_tile, hw_block), lambda i, k: (i, k))],
            out_specs=[pl.BlockSpec((row_tile, 1), lambda i, k: (i, 0)),
                       pl.BlockSpec((row_tile, 1), lambda i, k: (i, 0))],
            scratch_shapes=[pltpu.VMEM((row_tile, 1), jnp.float32),
                            pltpu.VMEM((row_tile, 1), jnp.float32)],
        ),
        compiler_params=pltpu.CompilerParams(
            dimension_semantics=("parallel", "arbitrary"),
            vmem_limit_bytes=vmem_limit),
    )(x2d)

    out2d = pl.pallas_call(
        _apply_kernel,
        out_shape=jax.ShapeDtypeStruct((rows, hw), x.dtype),
        grid_spec=pltpu.PrefetchScalarGridSpec(
            num_scalar_prefetch=0,
            grid=(n_row_blocks, n_hw_blocks),
            in_specs=[pl.BlockSpec((row_tile, hw_block), lambda i, k: (i, k)),
                      pl.BlockSpec((row_tile, 1), lambda i, k: (i, 0)),
                      pl.BlockSpec((row_tile, 1), lambda i, k: (i, 0))],
            out_specs=pl.BlockSpec((row_tile, hw_block), lambda i, k: (i, k)),
        ),
        compiler_params=pltpu.CompilerParams(
            dimension_semantics=("parallel", "parallel"),
            vmem_limit_bytes=vmem_limit),
    )(x2d, mean, inv)
    return out2d.reshape(B, C, H, W)


def _instance_norm_ref(x, epsilon=1e-8):
    # Pure-JAX reference mirroring the PyTorch module exactly.
    xc = x - jnp.mean(x, axis=(2, 3), keepdims=True)
    tmp = xc * xc
    inv = lax.rsqrt(jnp.mean(tmp, axis=(2, 3), keepdims=True) + epsilon)
    return xc * inv


if __name__ == "__main__":
    key = jax.random.PRNGKey(0)

    # Primary shape implied by the module (matches the original test).
    x = jax.random.normal(key, (2, 4, 16, 16), dtype=jnp.float32)
    out = jax.block_until_ready(instance_norm(x, epsilon=1e-8))
    ref = _instance_norm_ref(x, epsilon=1e-8)
    assert out.shape == x.shape and out.dtype == x.dtype
    assert jnp.allclose(out, ref, atol=1e-5, rtol=1e-5), "mismatch (path A)"

    k1, k2 = jax.random.split(key)

    # Small-H*W path (lane-dense transposed layout).
    x_small = jax.random.normal(k1, (2, 64, 8, 8), dtype=jnp.float32)
    out_small = jax.block_until_ready(instance_norm(x_small))
    assert jnp.allclose(out_small, _instance_norm_ref(x_small),
                        atol=1e-5, rtol=1e-5), "mismatch (path C)"

    # Split-reduction path, forced with a small hw_block so it is exercised at
    # a small shape (includes remainder blocks on both grid axes).
    x_big = jax.random.normal(k2, (1, 6, 30, 30), dtype=jnp.float32)
    out_big = jax.block_until_ready(instance_norm(x_big, hw_block=256))
    assert jnp.allclose(out_big, _instance_norm_ref(x_big),
                        atol=1e-5, rtol=1e-5), "mismatch (path B)"

    print("KERNEL_OK")
</pallas_src>

<mosaic_0001>
module attributes {stable_mosaic.version = 11 : i64} {
  func.func @_norm_rows_kernel(%arg0: i32, %arg1: memref<8x256xf32, #tpu.memory_space<vmem>>, %arg2: memref<8x256xf32, #tpu.memory_space<vmem>>) attributes {dimension_semantics = [#tpu.dimension_semantics<parallel>], iteration_bounds = array<i64: 1>, scalar_prefetch = 0 : i64, scratch_operands = 0 : i64, tpu.core_type = #tpu.core_type<tc>, window_params = [{transform_indices = @transform_0, window_bounds = array<i64: 8, 256>}, {transform_indices = @transform_1, window_bounds = array<i64: 8, 256>}]} {
    %c0 = arith.constant 0 : index
    %c0_0 = arith.constant 0 : index
    %0 = vector.load %arg1[%c0, %c0_0] : memref<8x256xf32, #tpu.memory_space<vmem>>, vector<8x256xf32>
    %cst = arith.constant dense<0.000000e+00> : vector<8xf32>
    %1 = vector.multi_reduction <add>, %0, %cst [1] : vector<8x256xf32> to vector<8xf32>
    %2 = vector.shape_cast %1 : vector<8xf32> to vector<8x1xf32>
    %cst_1 = arith.constant 2.560000e+02 : f32
    %3 = vector.broadcast %cst_1 : f32 to vector<8x1xf32>
    %4 = arith.divf %2, %3 : vector<8x1xf32>
    %5 = vector.broadcast %4 : vector<8x1xf32> to vector<8x256xf32>
    %6 = arith.subf %0, %5 : vector<8x256xf32>
    %7 = arith.mulf %6, %6 : vector<8x256xf32>
    %cst_2 = arith.constant dense<0.000000e+00> : vector<8xf32>
    %8 = vector.multi_reduction <add>, %7, %cst_2 [1] : vector<8x256xf32> to vector<8xf32>
    %9 = vector.shape_cast %8 : vector<8xf32> to vector<8x1xf32>
    %cst_3 = arith.constant 2.560000e+02 : f32
    %10 = vector.broadcast %cst_3 : f32 to vector<8x1xf32>
    %11 = arith.divf %9, %10 : vector<8x1xf32>
    %cst_4 = arith.constant 9.99999993E-9 : f32
    %12 = vector.broadcast %cst_4 : f32 to vector<8x1xf32>
    %13 = arith.addf %11, %12 : vector<8x1xf32>
    %14 = math.rsqrt %13 : vector<8x1xf32>
    %15 = vector.broadcast %14 : vector<8x1xf32> to vector<8x256xf32>
    %16 = arith.mulf %6, %15 : vector<8x256xf32>
    %c0_5 = arith.constant 0 : index
    %c0_6 = arith.constant 0 : index
    %17 = vector.load %arg2[%c0_5, %c0_6] : memref<8x256xf32, #tpu.memory_space<vmem>>, vector<8x256xf32>
    tpu.vector_store %arg2[%c0_5, %c0_6], %16 {strides = array<i32>} : memref<8x256xf32, #tpu.memory_space<vmem>>, vector<8x256xf32>,
    return
  }
  func.func @transform_0(%arg0: i32) -> (i32, i32) {
    %c0_i32 = arith.constant 0 : i32
    %c0_i32_0 = arith.constant 0 : i32
    return %arg0, %c0_i32 : i32, i32
  }
  func.func @transform_1(%arg0: i32) -> (i32, i32) {
    %c0_i32 = arith.constant 0 : i32
    %c0_i32_0 = arith.constant 0 : i32
    return %arg0, %c0_i32 : i32, i32
  }
}

</mosaic_0001>

<bundles_post_ra>
// kernel: tpu_custom_call.1
= control target key start
LH: loop header
LB: loop body
LE: loop exit
PB: predicated region body
PF: predicated region fallthrough
CT: control target
= control target key end

     0   :  { %6 = vsyncpa [#allocation3], 0  ;;  %s145_s0 = inlined_call_operand.hbm [shape: f32[8,256], index: 0, kind: input, shape index: {}]   ;;  %s146_s1 = inlined_call_operand.hbm [shape: f32[8,256], index: 1, kind: output, shape index: {}]  }
   0x1   :  { %7 = vsyncpa [#allocation4], 0  ;;  %s109_s6 = smov [#allocation2]   ;;  %s61_s10 = scalar_lea.hbm %s145_s0, 256 }
   0x2   :  { %s14_s7 = sshll.u32 %s109_s6, 4  ;;  %p62_p0 = scmp.ne.s32.totalorder %s145_s0, %s61_s10  ;;  %s15_s7 = int_to_ptr.vmem [resolvable:$true] %s14_s7 }
   0x3   :  { %p65_p1 = scmp.lt.u32.totalorder %s61_s10, %s145_s0 }
   0x5   :  { %p67_p2 = pnand %p65_p1, %p62_p0 }
   0x7   :  { %70 = shalt.err (!%p67_p2)
}
   0x8   :  { %s71_s15 = scalar_lea.vmem %s15_s7, 256  ;;  %p76_p4 = scmp.lt.s32.totalorder %s15_s7, %s15_s7 }
   0x9   :  { %p72_p3 = scmp.ne.s32.totalorder %s15_s7, %s71_s15  ;;  %p77_p5 = scmp.lt.s32.totalorder %s71_s15, %s71_s15 }
   0xb   :  { %p78_p6 = por %p77_p5, %p76_p4 }
   0xd   :  { %p79_p7 = pnand %p78_p6, %p72_p3 }
   0xf   :  { %82 = shalt.err (!%p79_p7)
}
  0x10   :  { %17 = dma.hbm_to_vmem [thread:$0]  %s145_s0, 256, %s15_s7, [#allocation3]  }
  0x11   :  { %105 = dma.done.wait [#allocation3], 256  }
  0x12   :  { %106 = vsyncadd [#allocation3], 4294967040  ;;  %v21_v0 = vld [vmem:[#allocation2] sm:$0xff]  ;;  %v22_v1 = vld [vmem:[#allocation2 + $0x8] sm:$0xff]  ;;  %s110_s18 = smov [#allocation5]  }
  0x13   :  { %v23_v2 = vadd.f32 %v22_v1, %v21_v0  ;;  %s48_s0 = sshll.u32 %s110_s18, 4  ;;  %s49_s0 = int_to_ptr.vmem [resolvable:$true] %s48_s0 }
  0x14   :  { %s83_s19 = scalar_lea.vmem %s49_s0, 256  ;;  %p88_p9 = scmp.lt.s32.totalorder %s49_s0, %s49_s0 }
  0x15   :  { %24 = vadd.xlane.f32.xlu0 %v23_v2  ;;  %p84_p8 = scmp.ne.s32.totalorder %s49_s0, %s83_s19  ;;  %p89_p10 = scmp.lt.s32.totalorder %s83_s19, %s83_s19 }
  0x17   :  { %p90_p11 = por %p89_p10, %p88_p9 }
  0x19   :  { %p91_p12 = pnand %p90_p11, %p84_p8 }
  0xa2   :  { %v25_v3 = vpop.xlane.xlu0 %24 }
  0xa3   :  { %v27_v4 = vmul.f32 0.00390625, %v25_v3 }
  0xa5   :  { %v28_v5 = vsub.f32 %v21_v0, %v27_v4  ;;  %v29_v6 = vsub.f32 %v22_v1, %v27_v4 }
  0xa7   :  { %v30_v7 = vmul.f32 %v28_v5, %v28_v5  ;;  %v31_v8 = vmul.f32 %v29_v6, %v29_v6 }
  0xa9   :  { %v32_v9 = vadd.f32 %v31_v8, %v30_v7 }
  0xab   :  { %33 = vadd.xlane.f32.xlu0 %v32_v9 }
 0x138   :  { %v34_v10 = vpop.xlane.xlu0 %33 }
 0x139   :  { %v35_v11 = vmul.f32 0.00390625, %v34_v10 }
 0x13b   :  { %v36_v12 = vadd.f32 1e-08, %v35_v11 }
 0x13d   :  { %59 = vrsqrt.f32 %v36_v12 }
 0x147   :  { %v60_v13 = vpop.eup %59 }
 0x148   :  { %v38_v14 = vmul.f32 %v60_v13, %v28_v5  ;;  %v39_v15 = vmul.f32 %v60_v13, %v29_v6 }
 0x14a   :  { %40 = vst [vmem:[#allocation5] sm:$0xff] %v38_v14  ;;  %41 = vst [vmem:[#allocation5 + $0x8] sm:$0xff] %v39_v15 }
 0x14b   :  { %94 = shalt.err (!%p91_p12)
}
 0x14c   :  { %s95_s22 = scalar_lea.hbm %s146_s1, 256 }
 0x14d   :  { %p96_p13 = scmp.ne.s32.totalorder %s146_s1, %s95_s22  ;;  %p99_p0 = scmp.lt.u32.totalorder %s95_s22, %s146_s1 }
 0x14f   :  { %p101_p1 = pnand %p99_p0, %p96_p13 }
 0x151   :  { %104 = shalt.err (!%p101_p1)
}
 0x152   :  { %51 = dma.vmem_to_hbm [thread:$0]  %s49_s0, 256, %s146_s1, [#allocation4]  }
 0x153   :  { %107 = dma.done.wait [#allocation4], 256  }
 0x154   :  { %108 = vsyncadd [#allocation4], 4294967040 }
 0x155   :  { %55 = vsyncpa [#allocation3], 1 }
 0x156   :  { %56 = vsyncpa [#allocation4], 1 }

</bundles_post_ra>
